<compile_context>
chip_gen: v7x
topology: tpu7x:2x2x1
jax: 0.10.0
libtpu: 0.0.40
codegen_flags: <defaults>
</compile_context>

<pallas_src>
import functools

import jax
import jax.numpy as jnp
from jax import lax
from jax.experimental import pallas as pl
from jax.experimental.pallas import tpu as pltpu


def linear_x2_kernel(x_ref, w_ref, b_ref, o_ref, acc_ref, *, precision):
    # x_ref:   [tm, tk]  activation tile
    # w_ref:   [tk, tn]  weight tile, already in [K, N] layout (MXU-native)
    # b_ref:   [1,  tn]  bias tile (f32, lane-dense)
    # o_ref:   [tm, tn]  output tile (lane-dense)
    # acc_ref: [tm, tn]  f32 accumulator, resident across the K grid axis
    k = pl.program_id(2)

    @pl.when(k == 0)
    def _():
        acc_ref[...] = jnp.zeros_like(acc_ref)

    acc_ref[...] += jnp.dot(
        x_ref[...], w_ref[...],
        preferred_element_type=jnp.float32,
        precision=precision,
    )

    @pl.when(k == pl.num_programs(2) - 1)
    def _():
        # Bias add + *2 in f32, single lane-dense store.
        o_ref[...] = ((acc_ref[...] + b_ref[...]) * 2.0).astype(o_ref.dtype)


def _round_up(v, m):
    return ((v + m - 1) // m) * m


def _vmem_budget_bytes():
    """Per-generation tile budget (leaves headroom for pipeline/internal scratch)."""
    try:
        cap = pltpu.get_tpu_info().vmem_capacity_bytes
    except Exception:
        cap = 64 * 1024 * 1024  # conservative fallback (v7x-sized)
    # ~40 MiB on 64 MiB parts (v7x), ~48 MiB on 128 MiB parts (v5e/v6e).
    return min(int(cap * 0.625), 48 * 1024 * 1024)


def _pick_tiles(B, N, K, in_bytes, out_bytes, budget):
    """Largest aligned tiles that fit the VMEM budget (double-buffered)."""
    tm = min(_round_up(B, 8), 512)
    tn = min(_round_up(N, 128), 1024)
    tk = min(_round_up(K, 128), 2048)

    def vmem_bytes(tm_, tn_, tk_):
        # double-buffered x / W / bias / out tiles + resident f32 accumulator
        return (2 * (tm_ * tk_ * in_bytes + tk_ * tn_ * in_bytes
                     + tn_ * 4 + tm_ * tn_ * out_bytes)
                + tm_ * tn_ * 4)

    def shrink(v, lo):
        return max(lo, _round_up(v // 2, lo))

    while vmem_bytes(tm, tn, tk) > budget and (tm > 8 or tn > 128 or tk > 128):
        if tk >= tn and tk >= tm and tk > 128:
            tk = shrink(tk, 128)       # fewer, larger K steps preferred last
        elif tn >= tm and tn > 128:
            tn = shrink(tn, 128)
        else:
            tm = shrink(tm, 8)

    # v7x megacore: keep the two "parallel" axes with >= 2 programs total so
    # both TensorCores get work (harmless on single-TC v5e/v6e).
    if _round_up(B, tm) // tm == 1 and _round_up(N, tn) // tn == 1 and tn > 128:
        tn = max(128, _round_up(tn // 2, 128))

    return tm, tn, tk


def linear_model_forward(x, weight, bias, *, compute_dtype=None):
    """y = (x @ weight.T + bias) * 2.

    x: [B, K], weight: [N, K] (PyTorch nn.Linear layout), bias: [N].
    compute_dtype: optional HBM-side dtype for x and the weight
      (e.g. jnp.bfloat16 on v6e/v7x); accumulation is always f32.
      Default None keeps f32 (exact nn.Linear numerics).
    """
    B, K = x.shape
    N, K2 = weight.shape
    assert K == K2 and bias.shape == (N,)
    out_dtype = x.dtype

    # One-time relayout of the static parameter to [K, N]; the kernel then
    # needs no in-kernel transposes of the RHS.
    w_kn = weight.T

    if compute_dtype is not None and compute_dtype != x.dtype:
        # HBM-side cast is what actually halves weight/activation DMA.
        x = x.astype(compute_dtype)
        w_kn = w_kn.astype(compute_dtype)
    in_bytes = jnp.dtype(x.dtype).itemsize
    out_bytes = jnp.dtype(out_dtype).itemsize

    budget = _vmem_budget_bytes()
    tm, tn, tk = _pick_tiles(B, N, K, in_bytes, out_bytes, budget)

    # Zero-pad to tile multiples (exact for the matmul; padded output rows /
    # cols are sliced off below). Avoids the full-dimension-fallback blow-up.
    Bp, Np, Kp = _round_up(B, tm), _round_up(N, tn), _round_up(K, tk)
    if (Bp, Kp) != (B, K):
        x = jnp.pad(x, ((0, Bp - B), (0, Kp - K)))
    if (Kp, Np) != (K, N):
        w_kn = jnp.pad(w_kn, ((0, Kp - K), (0, Np - N)))
    b2 = bias.astype(jnp.float32).reshape(1, N)
    if Np != N:
        b2 = jnp.pad(b2, ((0, 0), (0, Np - N)))

    gm, gn, gk = Bp // tm, Np // tn, Kp // tk
    grid = (gm, gn, gk)

    # Explicit matmul precision: true f32 MXU passes for f32 inputs
    # (nn.Linear / 1e-5 tolerance); bf16 storage is already single-pass.
    precision = (lax.Precision.HIGHEST if x.dtype == jnp.float32
                 else lax.Precision.DEFAULT)

    cost = pl.CostEstimate(
        flops=2 * Bp * Kp * Np,
        transcendentals=0,
        # Include tiling re-read factors: x re-read per N tile, W per M tile.
        bytes_accessed=(in_bytes * (Bp * Kp * gn + Kp * Np * gm)
                        + out_bytes * Bp * Np + 4 * Np),
    )

    out = pl.pallas_call(
        functools.partial(linear_x2_kernel, precision=precision),
        out_shape=jax.ShapeDtypeStruct((Bp, Np), out_dtype),
        grid_spec=pltpu.PrefetchScalarGridSpec(
            num_scalar_prefetch=0,
            grid=grid,
            in_specs=[
                pl.BlockSpec((tm, tk), lambda i, j, k: (i, k)),   # x
                pl.BlockSpec((tk, tn), lambda i, j, k: (k, j)),   # W^T [K, N]
                pl.BlockSpec((1, tn), lambda i, j, k: (0, j)),    # bias
            ],
            out_specs=pl.BlockSpec((tm, tn), lambda i, j, k: (i, j)),
            scratch_shapes=[pltpu.VMEM((tm, tn), jnp.float32)],
        ),
        compiler_params=pltpu.CompilerParams(
            dimension_semantics=("parallel", "parallel", "arbitrary"),
            vmem_limit_bytes=int(budget + (8 << 20)),
        ),
        cost_estimate=cost,
    )(x, w_kn, b2)

    if (Bp, Np) != (B, N):
        out = out[:B, :N]
    return out


if __name__ == "__main__":
    # Small shapes consistent with nn.Linear(in_features, out_features).
    batch, in_features, out_features = 8, 32, 128

    key = jax.random.PRNGKey(0)
    kx, kw, kb = jax.random.split(key, 3)

    # Deterministic param init mimicking PyTorch's U(-1/sqrt(in), 1/sqrt(in)).
    bound = 1.0 / (in_features ** 0.5)
    weight = jax.random.uniform(
        kw, (out_features, in_features), jnp.float32, -bound, bound)
    bias = jax.random.uniform(
        kb, (out_features,), jnp.float32, -bound, bound)
    x = jax.random.normal(kx, (batch, in_features), jnp.float32)

    out = linear_model_forward(x, weight, bias)
    out = jax.block_until_ready(out)

    # Correctness check against plain-JAX reference.
    ref = (x @ weight.T + bias) * 2.0
    assert out.shape == (batch, out_features)
    assert jnp.allclose(out, ref, atol=1e-5, rtol=1e-5)

    print("KERNEL_OK")
</pallas_src>

<mosaic_0001>
module attributes {stable_mosaic.version = 11 : i64} {
  func.func @linear_x2_kernel(%arg0: i32, %arg1: i32, %arg2: i32, %arg3: memref<8x128xf32, #tpu.memory_space<vmem>>, %arg4: memref<128x128xf32, #tpu.memory_space<vmem>>, %arg5: memref<1x128xf32, #tpu.memory_space<vmem>>, %arg6: memref<8x128xf32, #tpu.memory_space<vmem>>, %arg7: memref<8x128xf32, #tpu.memory_space<vmem>>) attributes {dimension_semantics = [#tpu.dimension_semantics<parallel>, #tpu.dimension_semantics<parallel>, #tpu.dimension_semantics<arbitrary>], iteration_bounds = array<i64: 1, 1, 1>, scalar_prefetch = 0 : i64, scratch_operands = 1 : i64, tpu.core_type = #tpu.core_type<tc>, window_params = [{transform_indices = @transform_0, window_bounds = array<i64: 8, 128>}, {transform_indices = @transform_1, window_bounds = array<i64: 128, 128>}, {transform_indices = @transform_2, window_bounds = array<i64: 1, 128>}, {transform_indices = @transform_3, window_bounds = array<i64: 8, 128>}]} {
    %c0_i32 = arith.constant 0 : i32
    %0 = arith.cmpi eq, %arg2, %c0_i32 : i32
    %1 = arith.extui %0 : i1 to i32
    %c0_i32_0 = arith.constant 0 : i32
    %2 = arith.cmpi ne, %1, %c0_i32_0 : i32
    scf.if %2 {
      %cst_10 = arith.constant 0.000000e+00 : f32
      %12 = vector.broadcast %cst_10 : f32 to vector<8x128xf32>
      %c0_11 = arith.constant 0 : index
      %c0_12 = arith.constant 0 : index
      %13 = vector.load %arg7[%c0_11, %c0_12] : memref<8x128xf32, #tpu.memory_space<vmem>>, vector<8x128xf32>
      tpu.vector_store %arg7[%c0_11, %c0_12], %12 {strides = array<i32>} : memref<8x128xf32, #tpu.memory_space<vmem>>, vector<8x128xf32>,
    } else {
    }
    %c0 = arith.constant 0 : index
    %c0_1 = arith.constant 0 : index
    %3 = vector.load %arg7[%c0, %c0_1] : memref<8x128xf32, #tpu.memory_space<vmem>>, vector<8x128xf32>
    %c0_2 = arith.constant 0 : index
    %c0_3 = arith.constant 0 : index
    %4 = vector.load %arg3[%c0_2, %c0_3] : memref<8x128xf32, #tpu.memory_space<vmem>>, vector<8x128xf32>
    %c0_4 = arith.constant 0 : index
    %c0_5 = arith.constant 0 : index
    %5 = vector.load %arg4[%c0_4, %c0_5] : memref<128x128xf32, #tpu.memory_space<vmem>>, vector<128x128xf32>
    %cst = arith.constant dense<0.000000e+00> : vector<8x128xf32>
    %6 = tpu.matmul %4, %5, %cst {dimension_numbers = #tpu.dot_dimension_numbers<[1], [0], [0], [1], [0, 0, 1, 1], [], []>, precision = #tpu.contract_precision<fp32>} : vector<8x128xf32>, vector<128x128xf32>, vector<8x128xf32> -> vector<8x128xf32>
    %7 = arith.addf %3, %6 : vector<8x128xf32>
    %c0_6 = arith.constant 0 : index
    %c0_7 = arith.constant 0 : index
    %8 = vector.load %arg7[%c0_6, %c0_7] : memref<8x128xf32, #tpu.memory_space<vmem>>, vector<8x128xf32>
    tpu.vector_store %arg7[%c0_6, %c0_7], %7 {strides = array<i32>} : memref<8x128xf32, #tpu.memory_space<vmem>>, vector<8x128xf32>,
    %c0_i32_8 = arith.constant 0 : i32
    %9 = arith.cmpi eq, %arg2, %c0_i32_8 : i32
    %10 = arith.extui %9 : i1 to i32
    %c0_i32_9 = arith.constant 0 : i32
    %11 = arith.cmpi ne, %10, %c0_i32_9 : i32
    scf.if %11 {
      %c0_10 = arith.constant 0 : index
      %c0_11 = arith.constant 0 : index
      %12 = vector.load %arg7[%c0_10, %c0_11] : memref<8x128xf32, #tpu.memory_space<vmem>>, vector<8x128xf32>
      %c0_12 = arith.constant 0 : index
      %c0_13 = arith.constant 0 : index
      %13 = vector.load %arg5[%c0_12, %c0_13] : memref<1x128xf32, #tpu.memory_space<vmem>>, vector<1x128xf32>
      %14 = vector.broadcast %13 : vector<1x128xf32> to vector<8x128xf32>
      %15 = arith.addf %12, %14 : vector<8x128xf32>
      %cst_14 = arith.constant 2.000000e+00 : f32
      %16 = vector.broadcast %cst_14 : f32 to vector<8x128xf32>
      %17 = arith.mulf %15, %16 : vector<8x128xf32>
      %c0_15 = arith.constant 0 : index
      %c0_16 = arith.constant 0 : index
      %18 = vector.load %arg6[%c0_15, %c0_16] : memref<8x128xf32, #tpu.memory_space<vmem>>, vector<8x128xf32>
      tpu.vector_store %arg6[%c0_15, %c0_16], %17 {strides = array<i32>} : memref<8x128xf32, #tpu.memory_space<vmem>>, vector<8x128xf32>,
    } else {
    }
    return
  }
  func.func @transform_0(%arg0: i32, %arg1: i32, %arg2: i32) -> (i32, i32) {
    %c0_i32 = arith.constant 0 : i32
    return %arg0, %arg2 : i32, i32
  }
  func.func @transform_1(%arg0: i32, %arg1: i32, %arg2: i32) -> (i32, i32) {
    %c0_i32 = arith.constant 0 : i32
    return %arg2, %arg1 : i32, i32
  }
  func.func @transform_2(%arg0: i32, %arg1: i32, %arg2: i32) -> (i32, i32) {
    %c0_i32 = arith.constant 0 : i32
    %c0_i32_0 = arith.constant 0 : i32
    return %c0_i32, %arg1 : i32, i32
  }
  func.func @transform_3(%arg0: i32, %arg1: i32, %arg2: i32) -> (i32, i32) {
    %c0_i32 = arith.constant 0 : i32
    return %arg0, %arg1 : i32, i32
  }
}

</mosaic_0001>

<bundles_post_ra>
// kernel: tpu_custom_call.1
= control target key start
LH: loop header
LB: loop body
LE: loop exit
PB: predicated region body
PF: predicated region fallthrough
CT: control target
= control target key end

     0   :  { %8 = vsyncpa [#allocation4], 0  ;;  %s1607_s0 = inlined_call_operand.hbm [shape: f32[8,128], index: 0, kind: input, shape index: {}]   ;;  %s1608_s1 = inlined_call_operand.hbm [shape: f32[128,128], index: 1, kind: input, shape index: {}]   ;;  %s1609_s2 = inlined_call_operand.vmem [shape: f32[1,128], index: 2, kind: input, shape index: {}]   ;;  %s1610_s3 = inlined_call_operand.hbm [shape: f32[8,128], index: 3, kind: output, shape index: {}]  }
   0x1   :  { %9 = vsyncpa [#allocation7], 0 }
   0x2   :  { %10 = vsyncpa [#allocation5], 0  ;;  %s1274_s12 = smov [#allocation3]   ;;  %s1275_s14 = smov [#allocation6]  }
   0x3   :  { %s17_s13 = sshll.u32 %s1274_s12, 4  ;;  %s26_s15 = sshll.u32 %s1275_s14, 4  ;;  %s18_s13 = int_to_ptr.vmem [resolvable:$true] %s17_s13  ;;  %s1302_s15 = int_to_ptr.vmem [resolvable:$true] %s26_s15 }
   0x4   :  { %s1202_s18 = scalar_lea.hbm %s1607_s0, 128 }
   0x5   :  { %p1203_p0 = scmp.ne.s32.totalorder %s1607_s0, %s1202_s18  ;;  %p1206_p1 = scmp.lt.u32.totalorder %s1202_s18, %s1607_s0 }
   0x7   :  { %p1208_p2 = pnand %p1206_p1, %p1203_p0 }
   0x9   :  { %1211 = shalt.err (!%p1208_p2)
}
   0xa   :  { %s1212_s23 = scalar_lea.vmem %s18_s13, 128  ;;  %p1217_p4 = scmp.lt.s32.totalorder %s18_s13, %s18_s13 }
   0xb   :  { %p1213_p3 = scmp.ne.s32.totalorder %s18_s13, %s1212_s23  ;;  %p1218_p5 = scmp.lt.s32.totalorder %s1212_s23, %s1212_s23 }
   0xd   :  { %p1219_p6 = por %p1218_p5, %p1217_p4 }
   0xf   :  { %p1220_p7 = pnand %p1219_p6, %p1213_p3 }
  0x11   :  { %1223 = shalt.err (!%p1220_p7)
}
  0x12   :  { %20 = dma.hbm_to_vmem [thread:$0]  %s1607_s0, 128, %s18_s13, [#allocation4]  }
  0x13   :  { %s1224_s28 = scalar_lea.hbm %s1608_s1, 2048 }
  0x14   :  { %p1225_p8 = scmp.ne.s32.totalorder %s1608_s1, %s1224_s28  ;;  %p1228_p9 = scmp.lt.u32.totalorder %s1224_s28, %s1608_s1 }
  0x16   :  { %p1230_p10 = pnand %p1228_p9, %p1225_p8 }
  0x18   :  { %1233 = shalt.err (!%p1230_p10)
}
  0x19   :  { %s1234_s6 = scalar_lea.vmem %s1302_s15, 2048  ;;  %p1239_p12 = scmp.lt.s32.totalorder %s1302_s15, %s1302_s15 }
  0x1a   :  { %p1235_p11 = scmp.ne.s32.totalorder %s1302_s15, %s1234_s6  ;;  %p1240_p13 = scmp.lt.s32.totalorder %s1234_s6, %s1234_s6 }
  0x1c   :  { %p1241_p0 = por %p1240_p13, %p1239_p12 }
  0x1e   :  { %p1242_p1 = pnand %p1241_p0, %p1235_p11 }
  0x20   :  { %1245 = shalt.err (!%p1242_p1)
}
  0x21   :  { %s1276_s0 = smov 128   ;;  %s1277_s7 = smov 8  }
  0x22   :  { %32 = dma.hbm_to_vmem [thread:$0]  %s1608_s1, 2048, %s1302_s15, [#allocation7], %s1276_s0, %s1276_s0, %s1277_s7  }
  0x23   :  { %1268 = dma.done.wait [#allocation4], 128  }
  0x24   :  { %1269 = vsyncadd [#allocation4], 4294967168 }
  0x25   :  { %1270 = dma.done.wait [#allocation7], 2048  }
  0x26   :  { %1271 = vsyncadd [#allocation7], 4294965248  ;;  %v1278_v0 = vmov 0.0|0.0   ;;  %vm1279_vm0 = vmmov 0   ;;  %v1280_v1 = vmov 0.0   ;;  %v48_v2 = vld [vmem:[#allocation6] sm:$0xff] }
  0x27   :  { %1050 = vmatprep.subr.bf16.mxu0 %v1278_v0  ;;  %1074 = vmatprep.subr.bf16.mxu1 %v1278_v0  ;;  %v49_v3 = vld [vmem:[#allocation6 + $0x8] sm:$0xff]  ;;  %v50_v4 = vld [vmem:[#allocation6 + $0x10] sm:$0xff]  ;;  %v65_v5 = vand.u32 4294901760, %v48_v2  ;;  %v51_v7 = vld [vmem:[#allocation6 + $0x18] sm:$0xff]  ;;  %s1281_s11 = smov [#allocation8]  }
  0x28   :  { %872 = vmatprep.mubr.msk.f32.mxu0 %vm1279_vm0, %v1280_v1  ;;  %907 = vmatprep.mubr.msk.f32.mxu1 %vm1279_vm0, %v1280_v1  ;;  %v68_v6 = vand.u32 4294901760, %v49_v3  ;;  %v71_v8 = vand.u32 4294901760, %v50_v4  ;;  %v52_v9 = vld [vmem:[#allocation6 + $0x20] sm:$0xff]  ;;  %v53_v10 = vld [vmem:[#allocation6 + $0x28] sm:$0xff]  ;;  %v74_v11 = vand.u32 4294901760, %v51_v7  ;;  %v54_v14 = vld [vmem:[#allocation6 + $0x30] sm:$0xff] }
  0x29   :  { %v77_v12 = vand.u32 4294901760, %v52_v9  ;;  %v80_v13 = vand.u32 4294901760, %v53_v10  ;;  %v1341_v16 = vsub.f32 %v48_v2, %v65_v5  ;;  %v55_v19 = vld [vmem:[#allocation6 + $0x38] sm:$0xff]  ;;  %v56_v20 = vld [vmem:[#allocation6 + $0x40] sm:$0xff]  ;;  %v83_v26 = vand.u32 4294901760, %v54_v14  ;;  %v57_v27 = vld [vmem:[#allocation6 + $0x48] sm:$0xff] }
  0x2a   :  { %v1339_v15 = vpack.c.bf16 %v68_v6, %v65_v5  ;;  %v1343_v17 = vsub.f32 %v49_v3, %v68_v6  ;;  %v1345_v18 = vsub.f32 %v50_v4, %v71_v8  ;;  %v1347_v21 = vpack.c.bf16 %v74_v11, %v71_v8  ;;  %v58_v40 = vld [vmem:[#allocation6 + $0x50] sm:$0xff]  ;;  %v59_v41 = vld [vmem:[#allocation6 + $0x58] sm:$0xff]  ;;  %v60_v50 = vld [vmem:[#allocation6 + $0x60] sm:$0xff]  ;;  %s727_s12 = sshll.u32 %s1281_s11, 4  ;;  %s728_s12 = int_to_ptr.vmem [resolvable:$true] %s727_s12 }
  0x2b   :  { %v1349_v22 = vsub.f32 %v51_v7, %v74_v11  ;;  %v1352_v23 = vsub.f32 %v52_v9, %v77_v12  ;;  %v158_v24 = vand.u32 4294901760, %v1341_v16  ;;  %v86_v28 = vand.u32 4294901760, %v55_v19  ;;  %v61_v59 = vld [vmem:[#allocation6 + $0x68] sm:$0xff]  ;;  %v62_v2 = vld [vmem:[#allocation6 + $0x70] sm:$0xff]  ;;  %v63_v7 = vld [vmem:[#allocation6 + $0x78] sm:$0xff]  ;;  %s1246_s13 = scalar_lea.vmem %s728_s12, 128  ;;  %p1251_p3 = scmp.lt.s32.totalorder %s728_s12, %s728_s12 }
  0x2c   :  { %1052 = vmatpush3.bf16.msra.mxu0 %v1339_v15  ;;  %v165_v25 = vand.u32 4294901760, %v1343_v17  ;;  %v172_v29 = vand.u32 4294901760, %v1345_v18  ;;  %v89_v31 = vand.u32 4294901760, %v56_v20  ;;  %v1359_v32 = vsub.f32 %v53_v10, %v80_v13  ;;  %p1247_p2 = scmp.ne.s32.totalorder %s728_s12, %s1246_s13  ;;  %p1252_p4 = scmp.lt.s32.totalorder %s1246_s13, %s1246_s13 }
  0x2d   :  { %1053 = vmatprep.subr.bf16.mxu0 %v1278_v0  ;;  %v179_v30 = vand.u32 4294901760, %v1349_v22  ;;  %v159_v33 = vsub.f32 %v1341_v16, %v158_v24  ;;  %v1367_v35 = vsub.f32 %v54_v14, %v83_v26  ;;  %v1369_v36 = vsub.f32 %v55_v19, %v86_v28 }
  0x2e   :  { %v166_v34 = vsub.f32 %v1343_v17, %v165_v25  ;;  %v173_v37 = vsub.f32 %v1345_v18, %v172_v29  ;;  %v92_v39 = vand.u32 4294901760, %v57_v27  ;;  %v1378_v42 = vpack.c.bf16 %v80_v13, %v77_v12  ;;  %p1253_p5 = por %p1252_p4, %p1251_p3 }
  0x2f   :  { %v180_v38 = vsub.f32 %v1349_v22, %v179_v30  ;;  %v160_v43 = vand.u32 4294901760, %v159_v33  ;;  %v1380_v45 = vpack.c.bf16 %v86_v28, %v83_v26  ;;  %v1383_v48 = vsub.f32 %v56_v20, %v89_v31 }
  0x30   :  { %1055 = vmatpush3.bf16.msra.mxu0 %v1347_v21  ;;  %v167_v44 = vand.u32 4294901760, %v166_v34  ;;  %v174_v46 = vand.u32 4294901760, %v173_v37  ;;  %v186_v49 = vand.u32 4294901760, %v1352_v23  ;;  %v193_v52 = vand.u32 4294901760, %v1359_v32  ;;  %p1254_p6 = pnand %p1253_p5, %p1247_p2 }
  0x31   :  { %1056 = vmatprep.subr.bf16.mxu0 %v1278_v0  ;;  %v181_v47 = vand.u32 4294901760, %v180_v38  ;;  %v95_v53 = vand.u32 4294901760, %v58_v40  ;;  %v98_v54 = vand.u32 4294901760, %v59_v41  ;;  %v1387_v55 = vsub.f32 %v57_v27, %v92_v39 }
  0x32   :  { %v1075_v51 = vpack.c.bf16 %v167_v44, %v160_v43  ;;  %v187_v56 = vsub.f32 %v1352_v23, %v186_v49  ;;  %v200_v57 = vand.u32 4294901760, %v1367_v35  ;;  %v207_v58 = vand.u32 4294901760, %v1369_v36 }
  0x33   :  { %v1078_v60 = vpack.c.bf16 %v181_v47, %v174_v46  ;;  %v1395_v61 = vpack.c.bf16 %v92_v39, %v89_v31  ;;  %v194_v62 = vsub.f32 %v1359_v32, %v193_v52  ;;  %v101_v63 = vand.u32 4294901760, %v60_v50  ;;  %v47_v31 = vld [vmem:[#allocation3] sm:$0xff] }
  0x34   :  { %1058 = vmatpush3.bf16.msra.mxu0 %v1378_v42  ;;  %1076 = vmatpush3.bf16.msra.mxu1 %v1075_v51  ;;  %v188_v3 = vand.u32 4294901760, %v187_v56  ;;  %v1402_v4 = vsub.f32 %v58_v40, %v95_v53  ;;  %v201_v5 = vsub.f32 %v1367_v35, %v200_v57  ;;  %v208_v6 = vsub.f32 %v1369_v36, %v207_v58 }
  0x35   :  { %1059 = vmatprep.subr.bf16.mxu0 %v1278_v0  ;;  %1077 = vmatprep.subr.bf16.mxu1 %v1278_v0  ;;  %v195_v8 = vand.u32 4294901760, %v194_v62  ;;  %v1410_v9 = vsub.f32 %v59_v41, %v98_v54  ;;  %v104_v10 = vand.u32 4294901760, %v61_v59  ;;  %v214_v11 = vand.u32 4294901760, %v1383_v48 }
  0x36   :  { %v202_v12 = vand.u32 4294901760, %v201_v5  ;;  %v209_v13 = vand.u32 4294901760, %v208_v6  ;;  %v221_v14 = vand.u32 4294901760, %v1387_v55  ;;  %v107_v19 = vand.u32 4294901760, %v62_v2 }
  0x37   :  { %v1081_v20 = vpack.c.bf16 %v195_v8, %v188_v3  ;;  %v1415_v26 = vsub.f32 %v60_v50, %v101_v63  ;;  %v1417_v27 = vsub.f32 %v61_v59, %v104_v10  ;;  %v110_v28 = vand.u32 4294901760, %v63_v7 }
  0x38   :  { %1061 = vmatpush3.bf16.msra.mxu0 %v1380_v45  ;;  %1079 = vmatpush3.bf16.msra.mxu1 %v1078_v60  ;;  %v215_v33 = vsub.f32 %v1383_v48, %v214_v11  ;;  %v222_v34 = vsub.f32 %v1387_v55, %v221_v14  ;;  %v228_v37 = vand.u32 4294901760, %v1402_v4  ;;  %v1428_v38 = vpack.c.bf16 %v98_v54, %v95_v53 }
  0x39   :  { %1062 = vmatprep.subr.bf16.mxu0 %v1278_v0  ;;  %1080 = vmatprep.subr.bf16.mxu1 %v1278_v0  ;;  %v1084_v39 = vpack.c.bf16 %v209_v13, %v202_v12  ;;  %v1430_v40 = vsub.f32 %v62_v2, %v107_v19  ;;  %v235_v41 = vand.u32 4294901760, %v1410_v9  ;;  %v1436_v47 = vand.u32 4294901760, %v47_v31 }
  0x3a   :  { %v216_v43 = vand.u32 4294901760, %v215_v33  ;;  %v223_v44 = vand.u32 4294901760, %v222_v34  ;;  %v229_v46 = vsub.f32 %v1402_v4, %v228_v37  ;;  %v1439_v50 = vsub.f32 %v63_v7, %v110_v28 }
  0x3b   :  { %v236_v51 = vsub.f32 %v1410_v9, %v235_v41  ;;  %v242_v53 = vand.u32 4294901760, %v1415_v26  ;;  %v249_v54 = vand.u32 4294901760, %v1417_v27  ;;  %v1449_v56 = vsub.f32 %v47_v31, %v1436_v47 }
  0x3c   :  { %1064 = vmatpush3.bf16.msra.mxu0 %v1395_v61  ;;  %1082 = vmatpush3.bf16.msra.mxu1 %v1081_v20  ;;  %v1451_v59 = vpack.c.bf16 %v104_v10, %v101_v63  ;;  %v1087_v60 = vpack.c.bf16 %v223_v44, %v216_v43  ;;  %v230_v62 = vand.u32 4294901760, %v229_v46  ;;  %v256_v3 = vand.u32 4294901760, %v1430_v40 }
  0x3d   :  { %1065 = vmatprep.subr.bf16.mxu0 %v1278_v0  ;;  %1083 = vmatprep.subr.bf16.mxu1 %v1278_v0  ;;  %v147_v2 = vand.u32 4294901760, %v1449_v56  ;;  %v237_v5 = vand.u32 4294901760, %v236_v51  ;;  %v243_v6 = vsub.f32 %v1415_v26, %v242_v53  ;;  %v250_v7 = vsub.f32 %v1417_v27, %v249_v54 }
  0x3e   :  { %v263_v63 = vand.u32 4294901760, %v1439_v50  ;;  %v1465_v8 = vpack.c.bf16 %v110_v28, %v107_v19  ;;  %v257_v12 = vsub.f32 %v1430_v40, %v256_v3  ;;  %v1099_v34 = vpack.c.bf16 %v1343_v17, %v1341_v16 }
  0x3f   :  { %v148_v10 = vsub.f32 %v1449_v56, %v147_v2  ;;  %v1090_v13 = vpack.c.bf16 %v237_v5, %v230_v62  ;;  %v244_v20 = vand.u32 4294901760, %v243_v6  ;;  %v251_v31 = vand.u32 4294901760, %v250_v7 }
  0x40   :  { %1067 = vmatpush3.bf16.msra.mxu0 %v1428_v38  ;;  %1085 = vmatpush3.bf16.msra.mxu1 %v1084_v39  ;;  %v264_v33 = vsub.f32 %v1439_v50, %v263_v63  ;;  %v258_v39 = vand.u32 4294901760, %v257_v12  ;;  %v1102_v46 = vpack.c.bf16 %v1349_v22, %v1345_v18  ;;  %v1105_v51 = vpack.c.bf16 %v1359_v32, %v1352_v23 }
  0x41   :  { %1068 = vmatprep.subr.bf16.mxu0 %v1278_v0  ;;  %1086 = vmatprep.subr.bf16.mxu1 %v1278_v0  ;;  %v149_v19 = vand.u32 4294901760, %v148_v10  ;;  %v1093_v28 = vpack.c.bf16 %v251_v31, %v244_v20  ;;  %v1111_v62 = vpack.c.bf16 %v1387_v55, %v1383_v48  ;;  %v1114_v5 = vpack.c.bf16 %v1410_v9, %v1402_v4 }
  0x42   :  { %v265_v43 = vand.u32 4294901760, %v264_v33  ;;  %v1117_v6 = vpack.c.bf16 %v1417_v27, %v1415_v26  ;;  %v1120_v7 = vpack.c.bf16 %v1439_v50, %v1430_v40  ;;  %v1147_v10 = vpack.c.bf16 %v165_v25, %v158_v24 }
  0x43   :  { %v1150_v12 = vpack.c.bf16 %v179_v30, %v172_v29  ;;  %v1153_v16 = vpack.c.bf16 %v193_v52, %v186_v49  ;;  %v1156_v17 = vpack.c.bf16 %v207_v58, %v200_v57  ;;  %v1165_v18 = vpack.c.bf16 %v249_v54, %v242_v53 }
  0x44   :  { %1070 = vmatpush3.bf16.msra.mxu0 %v1451_v59  ;;  %1088 = vmatpush3.bf16.msra.mxu1 %v1087_v60  ;;  %v1096_v44 = vpack.c.bf16 %v265_v43, %v258_v39  ;;  %v1108_v60 = vpack.c.bf16 %v1369_v36, %v1367_v35 }
  0x45   :  { %1071 = vmatprep.subr.bf16.mxu0 %v1278_v0  ;;  %1089 = vmatprep.subr.bf16.mxu1 %v1278_v0 }
  0x48   :  { %1073 = vmatpush3.bf16.msra.mxu0 %v1465_v8  ;;  %1091 = vmatpush3.bf16.msra.mxu1 %v1090_v13 }
  0x49   :  { %1092 = vmatprep.subr.bf16.mxu1 %v1278_v0  ;;  %1098 = vmatprep.subr.bf16.mxu0 %v1278_v0 }
  0x4b   :  { %873 = vmatmul.mubr.f32.vlgmr.msra.gmra.mrb[0].mxu0 %v149_v19 }
  0x4c   :  { %1094 = vmatpush3.bf16.msra.mxu1 %v1093_v28  ;;  %1100 = vmatpush3.bf16.msra.mxu0 %v1099_v34 }
  0x4d   :  { %1095 = vmatprep.subr.bf16.mxu1 %v1278_v0  ;;  %1101 = vmatprep.subr.bf16.mxu0 %v1278_v0 }
  0x4e   :  { %942 = vmatprep.mubr.msk.f32.mxu0 %vm1279_vm0, %v1280_v1 }
  0x50   :  { %1097 = vmatpush3.bf16.msra.mxu1 %v1096_v44  ;;  %1103 = vmatpush3.bf16.msra.mxu0 %v1102_v46 }
  0x51   :  { %1104 = vmatprep.subr.bf16.mxu0 %v1278_v0  ;;  %1122 = vmatprep.subr.bf16.mxu1 %v1278_v0 }
  0x53   :  { %908 = vmatmul.mubr.f32.vlgmr.msra.gmra.mrb[0].mxu1 %v1436_v47 }
  0x54   :  { %1106 = vmatpush3.bf16.msra.mxu0 %v1105_v51  ;;  %1124 = vmatpush3.bf16.msra.mxu1 %v1339_v15 }
  0x55   :  { %1107 = vmatprep.subr.bf16.mxu0 %v1278_v0  ;;  %1125 = vmatprep.subr.bf16.mxu1 %v1278_v0 }
  0x56   :  { %977 = vmatprep.mubr.msk.f32.mxu1 %vm1279_vm0, %v1280_v1 }
  0x58   :  { %1109 = vmatpush3.bf16.msra.mxu0 %v1108_v60  ;;  %1127 = vmatpush3.bf16.msra.mxu1 %v1347_v21 }
  0x59   :  { %1110 = vmatprep.subr.bf16.mxu0 %v1278_v0  ;;  %1128 = vmatprep.subr.bf16.mxu1 %v1278_v0 }
  0x5c   :  { %1112 = vmatpush3.bf16.msra.mxu0 %v1111_v62  ;;  %1130 = vmatpush3.bf16.msra.mxu1 %v1378_v42 }
  0x5d   :  { %1113 = vmatprep.subr.bf16.mxu0 %v1278_v0  ;;  %1131 = vmatprep.subr.bf16.mxu1 %v1278_v0 }
  0x60   :  { %1115 = vmatpush3.bf16.msra.mxu0 %v1114_v5  ;;  %1133 = vmatpush3.bf16.msra.mxu1 %v1380_v45 }
  0x61   :  { %1116 = vmatprep.subr.bf16.mxu0 %v1278_v0  ;;  %1134 = vmatprep.subr.bf16.mxu1 %v1278_v0 }
  0x64   :  { %1118 = vmatpush3.bf16.msra.mxu0 %v1117_v6  ;;  %1136 = vmatpush3.bf16.msra.mxu1 %v1395_v61 }
  0x65   :  { %1119 = vmatprep.subr.bf16.mxu0 %v1278_v0  ;;  %1137 = vmatprep.subr.bf16.mxu1 %v1278_v0 }
  0x68   :  { %1121 = vmatpush3.bf16.msra.mxu0 %v1120_v7  ;;  %1139 = vmatpush3.bf16.msra.mxu1 %v1428_v38 }
  0x69   :  { %1140 = vmatprep.subr.bf16.mxu1 %v1278_v0  ;;  %1146 = vmatprep.subr.bf16.mxu0 %v1278_v0 }
  0x6b   :  { %943 = vmatmul.mubr.f32.vlgmr.msra.gmra.mrb[2].mxu0 %v1449_v56 }
  0x6c   :  { %1142 = vmatpush3.bf16.msra.mxu1 %v1451_v59  ;;  %1148 = vmatpush3.bf16.msra.mxu0 %v1147_v10 }
  0x6d   :  { %1143 = vmatprep.subr.bf16.mxu1 %v1278_v0  ;;  %1149 = vmatprep.subr.bf16.mxu0 %v1278_v0 }
  0x6e   :  { %1012 = vmatprep.mubr.msk.f32.mxu0 %vm1279_vm0, %v1280_v1 }
  0x70   :  { %1145 = vmatpush3.bf16.msra.mxu1 %v1465_v8  ;;  %1151 = vmatpush3.bf16.msra.mxu0 %v1150_v12 }
  0x71   :  { %1152 = vmatprep.subr.bf16.mxu0 %v1278_v0  ;;  %1170 = vmatprep.subr.bf16.mxu1 %v1278_v0 }
  0x73   :  { %978 = vmatmul.mubr.f32.vlgmr.msra.gmra.mrb[2].mxu1 %v147_v2 }
  0x74   :  { %1154 = vmatpush3.bf16.msra.mxu0 %v1153_v16  ;;  %1172 = vmatpush3.bf16.msra.mxu1 %v1339_v15  ;;  %v1159_v15 = vpack.c.bf16 %v221_v14, %v214_v11 }
  0x75   :  { %1155 = vmatprep.subr.bf16.mxu0 %v1278_v0  ;;  %1173 = vmatprep.subr.bf16.mxu1 %v1278_v0 }
  0x76   :  { %1047 = vmatprep.mubr.msk.f32.mxu1 %vm1279_vm0, %v1280_v1  ;;  %v1162_v1 = vpack.c.bf16 %v235_v41, %v228_v37 }
  0x78   :  { %1157 = vmatpush3.bf16.msra.mxu0 %v1156_v17  ;;  %1175 = vmatpush3.bf16.msra.mxu1 %v1347_v21  ;;  %v1168_v21 = vpack.c.bf16 %v263_v63, %v256_v3 }
  0x79   :  { %1158 = vmatprep.subr.bf16.mxu0 %v1278_v0  ;;  %1176 = vmatprep.subr.bf16.mxu1 %v1278_v0 }
  0x7c   :  { %1160 = vmatpush3.bf16.msra.mxu0 %v1159_v15  ;;  %1178 = vmatpush3.bf16.msra.mxu1 %v1378_v42 }
  0x7d   :  { %1161 = vmatprep.subr.bf16.mxu0 %v1278_v0  ;;  %1179 = vmatprep.subr.bf16.mxu1 %v1278_v0 }
  0x80   :  { %1163 = vmatpush3.bf16.msra.mxu0 %v1162_v1  ;;  %1181 = vmatpush3.bf16.msra.mxu1 %v1380_v45 }
  0x81   :  { %1164 = vmatprep.subr.bf16.mxu0 %v1278_v0  ;;  %1182 = vmatprep.subr.bf16.mxu1 %v1278_v0 }
  0x84   :  { %1166 = vmatpush3.bf16.msra.mxu0 %v1165_v18  ;;  %1184 = vmatpush3.bf16.msra.mxu1 %v1395_v61 }
  0x85   :  { %1167 = vmatprep.subr.bf16.mxu0 %v1278_v0  ;;  %1185 = vmatprep.subr.bf16.mxu1 %v1278_v0 }
  0x88   :  { %1169 = vmatpush3.bf16.msra.mxu0 %v1168_v21  ;;  %1187 = vmatpush3.bf16.msra.mxu1 %v1428_v38 }
  0x89   :  { %1188 = vmatprep.subr.bf16.mxu1 %v1278_v0 }
  0x8b   :  { %1013 = vmatmul.mubr.f32.vlgmr.msra.gmra.mrb[4].mxu0 %v1436_v47 }
  0x8c   :  { %1190 = vmatpush3.bf16.msra.mxu1 %v1451_v59 }
  0x8d   :  { %1191 = vmatprep.subr.bf16.mxu1 %v1278_v0  ;;  %v737_v0 = vld [vmem:[%s1609_s2] ss:$0 sm:$0xff] }
  0x90   :  { %1193 = vmatpush3.bf16.msra.mxu1 %v1465_v8 }
  0x93   :  { %1048 = vmatmul.mubr.f32.vlgmr.msra.gmra.mrb[4].mxu1 %v1436_v47 }
 0x11e   :  { %v151_v22 = vpop.f32.mrb[0].mxu0 }
 0x11f   :  { %v874_v23 = vpop.f32.mrb[1].mxu0 }
 0x126   :  { %v302_v24 = vpop.f32.mrb[0].mxu1 }
 0x127   :  { %v303_v25 = vadd.f32 %v302_v24, %v151_v22  ;;  %v909_v29 = vpop.f32.mrb[1].mxu1 }
 0x13e   :  { %v406_v30 = vpop.f32.mrb[2].mxu0 }
 0x13f   :  { %v407_v32 = vadd.f32 %v406_v30, %v303_v25  ;;  %v944_v35 = vpop.f32.mrb[3].mxu0 }
 0x146   :  { %v495_v36 = vpop.f32.mrb[2].mxu1 }
 0x147   :  { %v496_v42 = vadd.f32 %v495_v36, %v407_v32  ;;  %v979_v45 = vpop.f32.mrb[3].mxu1 }
 0x15e   :  { %v614_v48 = vpop.f32.mrb[4].mxu0 }
 0x15f   :  { %v615_v49 = vadd.f32 %v614_v48, %v496_v42  ;;  %v1014_v52 = vpop.f32.mrb[5].mxu0 }
 0x166   :  { %v701_v55 = vpop.f32.mrb[4].mxu1 }
 0x167   :  { %v702_v57 = vadd.f32 %v701_v55, %v615_v49  ;;  %v1049_v58 = vpop.f32.mrb[5].mxu1 }
 0x169   :  { %v718_v61 = vadd.f32 %v737_v0, %v702_v57 }
 0x16b   :  { %v719_v4 = vmul.f32 2.0, %v718_v61 }
 0x16d   :  { %720 = vst [vmem:[#allocation8] sm:$0xff] %v719_v4 }
 0x16e   :  { %1257 = shalt.err (!%p1254_p6)
}
 0x16f   :  { %s1258_s16 = scalar_lea.hbm %s1610_s3, 128 }
 0x170   :  { %p1259_p7 = scmp.ne.s32.totalorder %s1610_s3, %s1258_s16  ;;  %p1262_p8 = scmp.lt.u32.totalorder %s1258_s16, %s1610_s3 }
 0x172   :  { %p1264_p9 = pnand %p1262_p8, %p1259_p7 }
 0x174   :  { %1267 = shalt.err (!%p1264_p9)
}
 0x175   :  { %730 = dma.vmem_to_hbm [thread:$0]  %s728_s12, 128, %s1610_s3, [#allocation5]  }
 0x176   :  { %1272 = dma.done.wait [#allocation5], 128  }
 0x177   :  { %1273 = vsyncadd [#allocation5], 4294967168 }
 0x178   :  { %734 = vsyncpa [#allocation4], 1 }
 0x179   :  { %735 = vsyncpa [#allocation7], 1 }
 0x17a   :  { %736 = vsyncpa [#allocation5], 1 }

</bundles_post_ra>
